<compile_context>
chip_gen: v5e
topology: v5e:2x2
jax: 0.10.0
libtpu: 0.0.40
codegen_flags: <defaults>
</compile_context>

<pallas_src>
import jax
import jax.numpy as jnp
from jax.experimental import pallas as pl
from jax.experimental.pallas import tpu as pltpu


def lstm_seq_kernel(x_ref, p_ref, out_ref):
    """Whole-sequence LSTM + deferred hidden2out projection, one invocation.

    x_ref : (S, B)       time-major scalar inputs
    p_ref : (H+3, 4H)    packed [W_hh^T ; W_ih^T ; bias ; w_out|b_out]
    out_ref: (1, S*B)    lane-contiguous output, row order s*B + b
    """
    S, B = x_ref.shape
    H4 = p_ref.shape[1]
    H = H4 // 4

    # Single VMEM->vreg load of all parameters, then static slices.
    p = p_ref[...]                       # (H+3, 4H)
    whh = p[0:H, :]                      # (H, 4H)   == W_hh^T
    wih = p[H:H + 1, :]                  # (1, 4H)   == W_ih^T  (input_size == 1)
    bias = p[H + 1:H + 2, :]             # (1, 4H)   == b_ih + b_hh
    w_out = p[H + 2:H + 3, 0:H]          # (1, H)    hidden2out.weight
    b_out = p[H + 2:H + 3, H:H + 1]      # (1, 1)    hidden2out.bias

    # Hoist the input contribution off the serial h/c critical path:
    # xwb[t] = x_t * W_ih^T + bias, computed for all steps in one shot.
    x = x_ref[...]                                               # (S, B)
    xwb = x[:, :, None] * wih[None, :, :] + bias[None, :, :]     # (S, B, 4H)

    # init_hidden(): zeros; h/c live in vregs across the unrolled recurrence.
    h = jnp.zeros((B, H), jnp.float32)
    c = jnp.zeros((B, H), jnp.float32)

    hs = []
    for t in range(S):                   # S small & static -> fully unrolled
        gates = xwb[t] + jnp.dot(h, whh, preferred_element_type=jnp.float32)

        # One full-width sigmoid + one full-width tanh (EUP), then slice.
        sg = jax.nn.sigmoid(gates)
        th = jnp.tanh(gates)
        i = sg[:, 0 * H:1 * H]
        f = sg[:, 1 * H:2 * H]
        g = th[:, 2 * H:3 * H]
        o = sg[:, 3 * H:4 * H]

        c = f * c + i * g
        h = o * jnp.tanh(c)
        hs.append(h)

    # Deferred hidden2out on a dense 2-D slab: (S*B, H), row = t*B + b.
    h_all = jnp.concatenate(hs, axis=0)                  # (S*B, H)
    y = jnp.sum(h_all * w_out, axis=-1) + b_out          # (S*B,) + (1,1) -> (1, S*B)
    out_ref[...] = y.astype(out_ref.dtype)               # single lane-dense store


def pack_params(params, *, hidden_dim):
    """Pack all parameters into one (H+3, 4H) f32 slab (done once, off hot path)."""
    H = hidden_dim
    whh_t = params["w_hh"].T.astype(jnp.float32)                          # (H, 4H)
    wih_t = params["w_ih"].T.astype(jnp.float32)                          # (1, 4H)
    bias = (params["b_ih"] + params["b_hh"]).reshape(1, 4 * H).astype(jnp.float32)
    out_row = jnp.zeros((1, 4 * H), jnp.float32)
    out_row = out_row.at[0, :H].set(params["w_out"].reshape(H).astype(jnp.float32))
    out_row = out_row.at[0, H].set(params["b_out"].reshape(()).astype(jnp.float32))
    return jnp.concatenate([whh_t, wih_t, bias, out_row], axis=0)         # (H+3, 4H)


def lstmpred_forward(seq, packed_params, *, batchsize, hidden_dim):
    """Pallas implementation of LSTMpred.forward."""
    B = batchsize
    x = seq.reshape(-1, B).astype(jnp.float32)           # time-major (S, B)
    S = x.shape[0]

    vmem = pl.BlockSpec(memory_space=pltpu.MemorySpace.VMEM)  # full array, one DMA
    y = pl.pallas_call(
        lstm_seq_kernel,
        out_shape=jax.ShapeDtypeStruct((1, S * B), jnp.float32),
        in_specs=[vmem, vmem],
        out_specs=vmem,
    )(x, packed_params)

    # lstm_out.view(s*b, h) -> hidden2out  ==>  (S*B, 1); row index = s*B + b.
    return y.reshape(S * B, 1)


def lstmpred_reference(seq, params, *, batchsize, hidden_dim):
    """Pure-JAX reference (lax.scan LSTM) for correctness checking."""
    B, H = batchsize, hidden_dim
    x = seq.reshape(-1, B, 1).astype(jnp.float32)
    w_ih, w_hh = params["w_ih"], params["w_hh"]
    b = params["b_ih"] + params["b_hh"]

    def step(carry, x_t):
        h, c = carry
        gates = x_t @ w_ih.T + h @ w_hh.T + b
        i = jax.nn.sigmoid(gates[:, 0 * H:1 * H])
        f = jax.nn.sigmoid(gates[:, 1 * H:2 * H])
        g = jnp.tanh(gates[:, 2 * H:3 * H])
        o = jax.nn.sigmoid(gates[:, 3 * H:4 * H])
        c = f * c + i * g
        h = o * jnp.tanh(c)
        return (h, c), h

    h0 = jnp.zeros((B, H), jnp.float32)
    c0 = jnp.zeros((B, H), jnp.float32)
    _, hs = jax.lax.scan(step, (h0, c0), x)
    hs = hs.reshape(-1, H)
    return hs @ params["w_out"].T + params["b_out"]


def init_params(key, *, input_size, hidden_dim):
    """Deterministic init, shapes as in nn.LSTM / nn.Linear (PyTorch conventions)."""
    H = hidden_dim
    k_lstm = 1.0 / jnp.sqrt(jnp.float32(H))
    k_lin = 1.0 / jnp.sqrt(jnp.float32(H))
    ks = jax.random.split(key, 6)
    u = lambda k, shape, bound: jax.random.uniform(
        k, shape, jnp.float32, -bound, bound)
    return {
        "w_ih": u(ks[0], (4 * H, input_size), k_lstm),  # weight_ih_l0
        "w_hh": u(ks[1], (4 * H, H), k_lstm),           # weight_hh_l0
        "b_ih": u(ks[2], (4 * H,), k_lstm),             # bias_ih_l0
        "b_hh": u(ks[3], (4 * H,), k_lstm),             # bias_hh_l0
        "w_out": u(ks[4], (1, H), k_lin),               # hidden2out.weight
        "b_out": u(ks[5], (1,), k_lin),                 # hidden2out.bias
    }


if __name__ == "__main__":
    input_size = 1      # forward() does seq.view(-1, batchsize, 1)
    hidden_dim = 32
    batchsize = 2
    seq_len = 8

    key = jax.random.PRNGKey(0)
    k_seq, k_par = jax.random.split(key)
    seq = jax.random.normal(k_seq, (seq_len, batchsize), jnp.float32)
    params = init_params(k_par, input_size=input_size, hidden_dim=hidden_dim)

    # Parameter packing happens once, outside the per-call hot path.
    packed = pack_params(params, hidden_dim=hidden_dim)
    packed = jax.block_until_ready(packed)

    out = lstmpred_forward(seq, packed, batchsize=batchsize,
                           hidden_dim=hidden_dim)
    out = jax.block_until_ready(out)

    ref = lstmpred_reference(seq, params, batchsize=batchsize,
                             hidden_dim=hidden_dim)
    assert out.shape == (seq_len * batchsize, 1), out.shape
    assert jnp.allclose(out, ref, rtol=1e-3, atol=1e-3), (
        float(jnp.max(jnp.abs(out - ref))))

    print("KERNEL_OK")
</pallas_src>

<mosaic_0001>
module attributes {stable_mosaic.version = 11 : i64} {
  func.func @lstm_seq_kernel(%arg0: memref<8x2xf32, #tpu.memory_space<vmem>>, %arg1: memref<35x128xf32, #tpu.memory_space<vmem>>, %arg2: memref<1x16xf32, #tpu.memory_space<vmem>>) attributes {dimension_semantics = [], scalar_prefetch = 0 : i64, scratch_operands = 0 : i64, tpu.core_type = #tpu.core_type<tc>} {
    %c0 = arith.constant 0 : index
    %c0_0 = arith.constant 0 : index
    %0 = vector.load %arg1[%c0, %c0_0] : memref<35x128xf32, #tpu.memory_space<vmem>>, vector<35x128xf32>
    %1 = vector.extract_strided_slice %0 {offsets = [0, 0], sizes = [32, 128], strides = [1, 1]} : vector<35x128xf32> to vector<32x128xf32>
    %2 = vector.extract_strided_slice %0 {offsets = [32, 0], sizes = [1, 128], strides = [1, 1]} : vector<35x128xf32> to vector<1x128xf32>
    %3 = vector.extract_strided_slice %0 {offsets = [33, 0], sizes = [1, 128], strides = [1, 1]} : vector<35x128xf32> to vector<1x128xf32>
    %4 = vector.extract_strided_slice %0 {offsets = [34, 0], sizes = [1, 32], strides = [1, 1]} : vector<35x128xf32> to vector<1x32xf32>
    %5 = vector.extract_strided_slice %0 {offsets = [34, 32], sizes = [1, 1], strides = [1, 1]} : vector<35x128xf32> to vector<1x1xf32>
    %c0_1 = arith.constant 0 : index
    %c0_2 = arith.constant 0 : index
    %6 = vector.load %arg0[%c0_1, %c0_2] : memref<8x2xf32, #tpu.memory_space<vmem>>, vector<8x2xf32>
    %7 = vector.shape_cast %6 : vector<8x2xf32> to vector<8x2x1xf32>
    %8 = vector.shape_cast %2 : vector<1x128xf32> to vector<1x1x128xf32>
    %9 = vector.broadcast %7 : vector<8x2x1xf32> to vector<8x2x128xf32>
    %10 = vector.broadcast %8 : vector<1x1x128xf32> to vector<8x2x128xf32>
    %11 = arith.mulf %9, %10 : vector<8x2x128xf32>
    %12 = vector.shape_cast %3 : vector<1x128xf32> to vector<1x1x128xf32>
    %13 = vector.broadcast %12 : vector<1x1x128xf32> to vector<8x2x128xf32>
    %14 = arith.addf %11, %13 : vector<8x2x128xf32>
    %cst = arith.constant 0.000000e+00 : f32
    %15 = vector.broadcast %cst : f32 to vector<2x32xf32>
    %cst_3 = arith.constant 0.000000e+00 : f32
    %16 = vector.broadcast %cst_3 : f32 to vector<2x32xf32>
    %17 = vector.extract_strided_slice %14 {offsets = [0, 0, 0], sizes = [1, 2, 128], strides = [1, 1, 1]} : vector<8x2x128xf32> to vector<1x2x128xf32>
    %18 = vector.shape_cast %17 : vector<1x2x128xf32> to vector<2x128xf32>
    %cst_4 = arith.constant dense<0.000000e+00> : vector<2x128xf32>
    %19 = tpu.matmul %15, %1, %cst_4 {dimension_numbers = #tpu.dot_dimension_numbers<[1], [0], [0], [1], [0, 0, 1, 1], [], []>} : vector<2x32xf32>, vector<32x128xf32>, vector<2x128xf32> -> vector<2x128xf32>
    %20 = arith.addf %18, %19 : vector<2x128xf32>
    %21 = arith.negf %20 : vector<2x128xf32>
    %22 = math.exp %21 : vector<2x128xf32>
    %cst_5 = arith.constant 1.000000e+00 : f32
    %23 = vector.broadcast %cst_5 : f32 to vector<2x128xf32>
    %24 = arith.addf %23, %22 : vector<2x128xf32>
    %25 = arith.divf %23, %24 : vector<2x128xf32>
    %26 = math.tanh %20 : vector<2x128xf32>
    %27 = vector.extract_strided_slice %25 {offsets = [0, 0], sizes = [2, 32], strides = [1, 1]} : vector<2x128xf32> to vector<2x32xf32>
    %28 = vector.extract_strided_slice %25 {offsets = [0, 32], sizes = [2, 32], strides = [1, 1]} : vector<2x128xf32> to vector<2x32xf32>
    %29 = vector.extract_strided_slice %26 {offsets = [0, 64], sizes = [2, 32], strides = [1, 1]} : vector<2x128xf32> to vector<2x32xf32>
    %30 = vector.extract_strided_slice %25 {offsets = [0, 96], sizes = [2, 32], strides = [1, 1]} : vector<2x128xf32> to vector<2x32xf32>
    %31 = arith.mulf %28, %16 : vector<2x32xf32>
    %32 = arith.mulf %27, %29 : vector<2x32xf32>
    %33 = arith.addf %31, %32 : vector<2x32xf32>
    %34 = math.tanh %33 : vector<2x32xf32>
    %35 = arith.mulf %30, %34 : vector<2x32xf32>
    %36 = vector.extract_strided_slice %14 {offsets = [1, 0, 0], sizes = [1, 2, 128], strides = [1, 1, 1]} : vector<8x2x128xf32> to vector<1x2x128xf32>
    %37 = vector.shape_cast %36 : vector<1x2x128xf32> to vector<2x128xf32>
    %cst_6 = arith.constant dense<0.000000e+00> : vector<2x128xf32>
    %38 = tpu.matmul %35, %1, %cst_6 {dimension_numbers = #tpu.dot_dimension_numbers<[1], [0], [0], [1], [0, 0, 1, 1], [], []>} : vector<2x32xf32>, vector<32x128xf32>, vector<2x128xf32> -> vector<2x128xf32>
    %39 = arith.addf %37, %38 : vector<2x128xf32>
    %40 = arith.negf %39 : vector<2x128xf32>
    %41 = math.exp %40 : vector<2x128xf32>
    %cst_7 = arith.constant 1.000000e+00 : f32
    %42 = vector.broadcast %cst_7 : f32 to vector<2x128xf32>
    %43 = arith.addf %42, %41 : vector<2x128xf32>
    %44 = arith.divf %42, %43 : vector<2x128xf32>
    %45 = math.tanh %39 : vector<2x128xf32>
    %46 = vector.extract_strided_slice %44 {offsets = [0, 0], sizes = [2, 32], strides = [1, 1]} : vector<2x128xf32> to vector<2x32xf32>
    %47 = vector.extract_strided_slice %44 {offsets = [0, 32], sizes = [2, 32], strides = [1, 1]} : vector<2x128xf32> to vector<2x32xf32>
    %48 = vector.extract_strided_slice %45 {offsets = [0, 64], sizes = [2, 32], strides = [1, 1]} : vector<2x128xf32> to vector<2x32xf32>
    %49 = vector.extract_strided_slice %44 {offsets = [0, 96], sizes = [2, 32], strides = [1, 1]} : vector<2x128xf32> to vector<2x32xf32>
    %50 = arith.mulf %47, %33 : vector<2x32xf32>
    %51 = arith.mulf %46, %48 : vector<2x32xf32>
    %52 = arith.addf %50, %51 : vector<2x32xf32>
    %53 = math.tanh %52 : vector<2x32xf32>
    %54 = arith.mulf %49, %53 : vector<2x32xf32>
    %55 = vector.extract_strided_slice %14 {offsets = [2, 0, 0], sizes = [1, 2, 128], strides = [1, 1, 1]} : vector<8x2x128xf32> to vector<1x2x128xf32>
    %56 = vector.shape_cast %55 : vector<1x2x128xf32> to vector<2x128xf32>
    %cst_8 = arith.constant dense<0.000000e+00> : vector<2x128xf32>
    %57 = tpu.matmul %54, %1, %cst_8 {dimension_numbers = #tpu.dot_dimension_numbers<[1], [0], [0], [1], [0, 0, 1, 1], [], []>} : vector<2x32xf32>, vector<32x128xf32>, vector<2x128xf32> -> vector<2x128xf32>
    %58 = arith.addf %56, %57 : vector<2x128xf32>
    %59 = arith.negf %58 : vector<2x128xf32>
    %60 = math.exp %59 : vector<2x128xf32>
    %cst_9 = arith.constant 1.000000e+00 : f32
    %61 = vector.broadcast %cst_9 : f32 to vector<2x128xf32>
    %62 = arith.addf %61, %60 : vector<2x128xf32>
    %63 = arith.divf %61, %62 : vector<2x128xf32>
    %64 = math.tanh %58 : vector<2x128xf32>
    %65 = vector.extract_strided_slice %63 {offsets = [0, 0], sizes = [2, 32], strides = [1, 1]} : vector<2x128xf32> to vector<2x32xf32>
    %66 = vector.extract_strided_slice %63 {offsets = [0, 32], sizes = [2, 32], strides = [1, 1]} : vector<2x128xf32> to vector<2x32xf32>
    %67 = vector.extract_strided_slice %64 {offsets = [0, 64], sizes = [2, 32], strides = [1, 1]} : vector<2x128xf32> to vector<2x32xf32>
    %68 = vector.extract_strided_slice %63 {offsets = [0, 96], sizes = [2, 32], strides = [1, 1]} : vector<2x128xf32> to vector<2x32xf32>
    %69 = arith.mulf %66, %52 : vector<2x32xf32>
    %70 = arith.mulf %65, %67 : vector<2x32xf32>
    %71 = arith.addf %69, %70 : vector<2x32xf32>
    %72 = math.tanh %71 : vector<2x32xf32>
    %73 = arith.mulf %68, %72 : vector<2x32xf32>
    %74 = vector.extract_strided_slice %14 {offsets = [3, 0, 0], sizes = [1, 2, 128], strides = [1, 1, 1]} : vector<8x2x128xf32> to vector<1x2x128xf32>
    %75 = vector.shape_cast %74 : vector<1x2x128xf32> to vector<2x128xf32>
    %cst_10 = arith.constant dense<0.000000e+00> : vector<2x128xf32>
    %76 = tpu.matmul %73, %1, %cst_10 {dimension_numbers = #tpu.dot_dimension_numbers<[1], [0], [0], [1], [0, 0, 1, 1], [], []>} : vector<2x32xf32>, vector<32x128xf32>, vector<2x128xf32> -> vector<2x128xf32>
    %77 = arith.addf %75, %76 : vector<2x128xf32>
    %78 = arith.negf %77 : vector<2x128xf32>
    %79 = math.exp %78 : vector<2x128xf32>
    %cst_11 = arith.constant 1.000000e+00 : f32
    %80 = vector.broadcast %cst_11 : f32 to vector<2x128xf32>
    %81 = arith.addf %80, %79 : vector<2x128xf32>
    %82 = arith.divf %80, %81 : vector<2x128xf32>
    %83 = math.tanh %77 : vector<2x128xf32>
    %84 = vector.extract_strided_slice %82 {offsets = [0, 0], sizes = [2, 32], strides = [1, 1]} : vector<2x128xf32> to vector<2x32xf32>
    %85 = vector.extract_strided_slice %82 {offsets = [0, 32], sizes = [2, 32], strides = [1, 1]} : vector<2x128xf32> to vector<2x32xf32>
    %86 = vector.extract_strided_slice %83 {offsets = [0, 64], sizes = [2, 32], strides = [1, 1]} : vector<2x128xf32> to vector<2x32xf32>
    %87 = vector.extract_strided_slice %82 {offsets = [0, 96], sizes = [2, 32], strides = [1, 1]} : vector<2x128xf32> to vector<2x32xf32>
    %88 = arith.mulf %85, %71 : vector<2x32xf32>
    %89 = arith.mulf %84, %86 : vector<2x32xf32>
    %90 = arith.addf %88, %89 : vector<2x32xf32>
    %91 = math.tanh %90 : vector<2x32xf32>
    %92 = arith.mulf %87, %91 : vector<2x32xf32>
    %93 = vector.extract_strided_slice %14 {offsets = [4, 0, 0], sizes = [1, 2, 128], strides = [1, 1, 1]} : vector<8x2x128xf32> to vector<1x2x128xf32>
    %94 = vector.shape_cast %93 : vector<1x2x128xf32> to vector<2x128xf32>
    %cst_12 = arith.constant dense<0.000000e+00> : vector<2x128xf32>
    %95 = tpu.matmul %92, %1, %cst_12 {dimension_numbers = #tpu.dot_dimension_numbers<[1], [0], [0], [1], [0, 0, 1, 1], [], []>} : vector<2x32xf32>, vector<32x128xf32>, vector<2x128xf32> -> vector<2x128xf32>
    %96 = arith.addf %94, %95 : vector<2x128xf32>
    %97 = arith.negf %96 : vector<2x128xf32>
    %98 = math.exp %97 : vector<2x128xf32>
    %cst_13 = arith.constant 1.000000e+00 : f32
    %99 = vector.broadcast %cst_13 : f32 to vector<2x128xf32>
    %100 = arith.addf %99, %98 : vector<2x128xf32>
    %101 = arith.divf %99, %100 : vector<2x128xf32>
    %102 = math.tanh %96 : vector<2x128xf32>
    %103 = vector.extract_strided_slice %101 {offsets = [0, 0], sizes = [2, 32], strides = [1, 1]} : vector<2x128xf32> to vector<2x32xf32>
    %104 = vector.extract_strided_slice %101 {offsets = [0, 32], sizes = [2, 32], strides = [1, 1]} : vector<2x128xf32> to vector<2x32xf32>
    %105 = vector.extract_strided_slice %102 {offsets = [0, 64], sizes = [2, 32], strides = [1, 1]} : vector<2x128xf32> to vector<2x32xf32>
    %106 = vector.extract_strided_slice %101 {offsets = [0, 96], sizes = [2, 32], strides = [1, 1]} : vector<2x128xf32> to vector<2x32xf32>
    %107 = arith.mulf %104, %90 : vector<2x32xf32>
    %108 = arith.mulf %103, %105 : vector<2x32xf32>
    %109 = arith.addf %107, %108 : vector<2x32xf32>
    %110 = math.tanh %109 : vector<2x32xf32>
    %111 = arith.mulf %106, %110 : vector<2x32xf32>
    %112 = vector.extract_strided_slice %14 {offsets = [5, 0, 0], sizes = [1, 2, 128], strides = [1, 1, 1]} : vector<8x2x128xf32> to vector<1x2x128xf32>
    %113 = vector.shape_cast %112 : vector<1x2x128xf32> to vector<2x128xf32>
    %cst_14 = arith.constant dense<0.000000e+00> : vector<2x128xf32>
    %114 = tpu.matmul %111, %1, %cst_14 {dimension_numbers = #tpu.dot_dimension_numbers<[1], [0], [0], [1], [0, 0, 1, 1], [], []>} : vector<2x32xf32>, vector<32x128xf32>, vector<2x128xf32> -> vector<2x128xf32>
    %115 = arith.addf %113, %114 : vector<2x128xf32>
    %116 = arith.negf %115 : vector<2x128xf32>
    %117 = math.exp %116 : vector<2x128xf32>
    %cst_15 = arith.constant 1.000000e+00 : f32
    %118 = vector.broadcast %cst_15 : f32 to vector<2x128xf32>
    %119 = arith.addf %118, %117 : vector<2x128xf32>
    %120 = arith.divf %118, %119 : vector<2x128xf32>
    %121 = math.tanh %115 : vector<2x128xf32>
    %122 = vector.extract_strided_slice %120 {offsets = [0, 0], sizes = [2, 32], strides = [1, 1]} : vector<2x128xf32> to vector<2x32xf32>
    %123 = vector.extract_strided_slice %120 {offsets = [0, 32], sizes = [2, 32], strides = [1, 1]} : vector<2x128xf32> to vector<2x32xf32>
    %124 = vector.extract_strided_slice %121 {offsets = [0, 64], sizes = [2, 32], strides = [1, 1]} : vector<2x128xf32> to vector<2x32xf32>
    %125 = vector.extract_strided_slice %120 {offsets = [0, 96], sizes = [2, 32], strides = [1, 1]} : vector<2x128xf32> to vector<2x32xf32>
    %126 = arith.mulf %123, %109 : vector<2x32xf32>
    %127 = arith.mulf %122, %124 : vector<2x32xf32>
    %128 = arith.addf %126, %127 : vector<2x32xf32>
    %129 = math.tanh %128 : vector<2x32xf32>
    %130 = arith.mulf %125, %129 : vector<2x32xf32>
    %131 = vector.extract_strided_slice %14 {offsets = [6, 0, 0], sizes = [1, 2, 128], strides = [1, 1, 1]} : vector<8x2x128xf32> to vector<1x2x128xf32>
    %132 = vector.shape_cast %131 : vector<1x2x128xf32> to vector<2x128xf32>
    %cst_16 = arith.constant dense<0.000000e+00> : vector<2x128xf32>
    %133 = tpu.matmul %130, %1, %cst_16 {dimension_numbers = #tpu.dot_dimension_numbers<[1], [0], [0], [1], [0, 0, 1, 1], [], []>} : vector<2x32xf32>, vector<32x128xf32>, vector<2x128xf32> -> vector<2x128xf32>
    %134 = arith.addf %132, %133 : vector<2x128xf32>
    %135 = arith.negf %134 : vector<2x128xf32>
    %136 = math.exp %135 : vector<2x128xf32>
    %cst_17 = arith.constant 1.000000e+00 : f32
    %137 = vector.broadcast %cst_17 : f32 to vector<2x128xf32>
    %138 = arith.addf %137, %136 : vector<2x128xf32>
    %139 = arith.divf %137, %138 : vector<2x128xf32>
    %140 = math.tanh %134 : vector<2x128xf32>
    %141 = vector.extract_strided_slice %139 {offsets = [0, 0], sizes = [2, 32], strides = [1, 1]} : vector<2x128xf32> to vector<2x32xf32>
    %142 = vector.extract_strided_slice %139 {offsets = [0, 32], sizes = [2, 32], strides = [1, 1]} : vector<2x128xf32> to vector<2x32xf32>
    %143 = vector.extract_strided_slice %140 {offsets = [0, 64], sizes = [2, 32], strides = [1, 1]} : vector<2x128xf32> to vector<2x32xf32>
    %144 = vector.extract_strided_slice %139 {offsets = [0, 96], sizes = [2, 32], strides = [1, 1]} : vector<2x128xf32> to vector<2x32xf32>
    %145 = arith.mulf %142, %128 : vector<2x32xf32>
    %146 = arith.mulf %141, %143 : vector<2x32xf32>
    %147 = arith.addf %145, %146 : vector<2x32xf32>
    %148 = math.tanh %147 : vector<2x32xf32>
    %149 = arith.mulf %144, %148 : vector<2x32xf32>
    %150 = vector.extract_strided_slice %14 {offsets = [7, 0, 0], sizes = [1, 2, 128], strides = [1, 1, 1]} : vector<8x2x128xf32> to vector<1x2x128xf32>
    %151 = vector.shape_cast %150 : vector<1x2x128xf32> to vector<2x128xf32>
    %cst_18 = arith.constant dense<0.000000e+00> : vector<2x128xf32>
    %152 = tpu.matmul %149, %1, %cst_18 {dimension_numbers = #tpu.dot_dimension_numbers<[1], [0], [0], [1], [0, 0, 1, 1], [], []>} : vector<2x32xf32>, vector<32x128xf32>, vector<2x128xf32> -> vector<2x128xf32>
    %153 = arith.addf %151, %152 : vector<2x128xf32>
    %154 = arith.negf %153 : vector<2x128xf32>
    %155 = math.exp %154 : vector<2x128xf32>
    %cst_19 = arith.constant 1.000000e+00 : f32
    %156 = vector.broadcast %cst_19 : f32 to vector<2x128xf32>
    %157 = arith.addf %156, %155 : vector<2x128xf32>
    %158 = arith.divf %156, %157 : vector<2x128xf32>
    %159 = math.tanh %153 : vector<2x128xf32>
    %160 = vector.extract_strided_slice %158 {offsets = [0, 0], sizes = [2, 32], strides = [1, 1]} : vector<2x128xf32> to vector<2x32xf32>
    %161 = vector.extract_strided_slice %158 {offsets = [0, 32], sizes = [2, 32], strides = [1, 1]} : vector<2x128xf32> to vector<2x32xf32>
    %162 = vector.extract_strided_slice %159 {offsets = [0, 64], sizes = [2, 32], strides = [1, 1]} : vector<2x128xf32> to vector<2x32xf32>
    %163 = vector.extract_strided_slice %158 {offsets = [0, 96], sizes = [2, 32], strides = [1, 1]} : vector<2x128xf32> to vector<2x32xf32>
    %164 = arith.mulf %161, %147 : vector<2x32xf32>
    %165 = arith.mulf %160, %162 : vector<2x32xf32>
    %166 = arith.addf %164, %165 : vector<2x32xf32>
    %167 = math.tanh %166 : vector<2x32xf32>
    %168 = arith.mulf %163, %167 : vector<2x32xf32>
    %169 = tpu.concatenate %35, %54, %73, %92, %111, %130, %149, %168 in 0 : vector<2x32xf32>, vector<2x32xf32>, vector<2x32xf32>, vector<2x32xf32>, vector<2x32xf32>, vector<2x32xf32>, vector<2x32xf32>, vector<2x32xf32> -> vector<16x32xf32>
    %170 = vector.broadcast %4 : vector<1x32xf32> to vector<16x32xf32>
    %171 = arith.mulf %169, %170 : vector<16x32xf32>
    %cst_20 = arith.constant dense<0.000000e+00> : vector<16xf32>
    %172 = vector.multi_reduction <add>, %171, %cst_20 [1] : vector<16x32xf32> to vector<16xf32>
    %173 = vector.shape_cast %172 : vector<16xf32> to vector<1x16xf32>
    %174 = vector.broadcast %5 : vector<1x1xf32> to vector<1x16xf32>
    %175 = arith.addf %173, %174 : vector<1x16xf32>
    %c0_21 = arith.constant 0 : index
    %c0_22 = arith.constant 0 : index
    %176 = vector.load %arg2[%c0_21, %c0_22] : memref<1x16xf32, #tpu.memory_space<vmem>>, vector<1x16xf32>
    tpu.vector_store %arg2[%c0_21, %c0_22], %175 {strides = array<i32>} : memref<1x16xf32, #tpu.memory_space<vmem>>, vector<1x16xf32>,
    return
  }
}

</mosaic_0001>

<bundles_post_ra>
// kernel: tpu_custom_call.1
= control target key start
LH: loop header
LB: loop body
LE: loop exit
PB: predicated region body
PF: predicated region fallthrough
CT: control target
= control target key end

     0   :  { %7 = vsyncpa [#allocation3], 0  ;;  %s974_s0 = inlined_call_operand.vmem [shape: f32[8,2], index: 0, kind: input, shape index: {}]   ;;  %s975_s1 = inlined_call_operand.hbm [shape: f32[35,128], index: 1, kind: input, shape index: {}]   ;;  %s976_s2 = inlined_call_operand.hbm [shape: f32[1,16], index: 2, kind: output, shape index: {}]  }
   0x1   :  { %8 = vsyncpa [#allocation4], 0  ;;  %s15_s11 = sshll.u32 %s975_s1, 4  ;;  %s843_s12 = smov [#allocation2]   ;;  %s16_s11 = int_to_ptr.hbm [resolvable:$true] %s15_s11 }
   0x2   :  { %s17_s13 = sshll.u32 %s843_s12, 4  ;;  %s844_s14 = smov 128   ;;  %s18_s13 = int_to_ptr.vmem [resolvable:$true] %s17_s13 }
   0x3   :  { %s845_s15 = smov 8  }
   0x4   :  { %23 = dma.hbm_to_vmem [thread:$0]  %s16_s11, 640, %s18_s13, [#allocation3], %s844_s14, %s844_s14, %s845_s15  }
   0x5   :  { %839 = dma.done.wait [#allocation3], 640  }
   0x6   :  { %840 = vsyncadd [#allocation3], 4294966656  ;;  %v35_v0 = vlaneseq  ;;  %v31_v2 = vld [vmem:[#allocation2 + $0x18] sm:$0xff]  ;;  %v30_v3 = vld [vmem:[#allocation2 + $0x10] sm:$0xff]  ;;  %v846_v8 = vmov 0.0   ;;  %s848_s17 = smov 32  }
   0x7   :  { %124 = vmatpush.msra.mxu0 %v31_v2  ;;  %v875_v4 = vld [vmem:[%s974_s0] sm:$0xff]  ;;  %187 = vmatpush.msra.mxu1 %v31_v2  ;;  %v29_v5 = vld [vmem:[#allocation2 + $0x8] sm:$0xff]  ;;  %s847_s0 = smov 64   ;;  %vm108_vm4 = vcmask 261120   ;;  %vm624_vm13 = vcmask 1041408   ;;  %vm626_vm14 = vcmask 1043456  }
   0x8   :  { %v36_v1 = vshrl.u32 %v35_v0, 7  ;;  %v34_v6 = vperm.slane %v875_v4, 0  ;;  %250 = vmatpush.msra.mxu2 %v31_v2  ;;  %313 = vmatpush.msra.mxu3 %v31_v2  ;;  %v28_v7 = vld [vmem:[#allocation2] sm:$0xff]  ;;  %v41_v39 = vperm.slane %v875_v4, 1  ;;  %s849_s18 = smov 96   ;;  %s852_s19 = smov [#allocation5]  }
   0x9   :  { %125 = vmatpush.msra.mxu0 %v30_v3  ;;  %188 = vmatpush.msra.mxu1 %v30_v3  ;;  %v878_v9 = vld [vmem:[#allocation2 + $0x20] sm:$0x7]  ;;  %s685_s20 = sshll.u32 %s852_s19, 4  ;;  %s687_s23 = sshll.u32 %s976_s2, 4  ;;  %s686_s20 = int_to_ptr.vmem [resolvable:$true] %s685_s20  ;;  %s688_s23 = int_to_ptr.hbm [resolvable:$true] %s687_s23 }
   0xa   :  { %722 = vset.pattern.permute.xlu0 %v36_v1  ;;  %723 = vset.pattern.permute.xlu2 %v36_v1  ;;  %v881_v10 = vperm.slane %v878_v9, 0  ;;  %v885_v13 = vperm.slane %v878_v9, 1 }
   0xb   :  { %724 = vset.pattern.permute.xlu1 %v36_v1  ;;  %251 = vmatpush.msra.mxu2 %v30_v3 }
   0xc   :  { %314 = vmatpush.msra.mxu3 %v30_v3  ;;  %126 = vmatpush.msra.mxu0 %v29_v5 }
   0xd   :  { %189 = vmatpush.msra.mxu1 %v29_v5  ;;  %252 = vmatpush.msra.mxu2 %v29_v5 }
   0xe   :  { %127 = vmatpush.msra.mxu0 %v28_v7  ;;  %315 = vmatpush.msra.mxu3 %v29_v5 }
   0xf   :  { %128 = vmatmul.f32.vlgmr.msra.gmra.mxu0 %v846_v8  ;;  %190 = vmatpush.msra.mxu1 %v28_v7 }
  0x10   :  { %253 = vmatpush.msra.mxu2 %v28_v7  ;;  %316 = vmatpush.msra.mxu3 %v28_v7 }
  0x11   :  { %376 = vmatpush.msrb.mxu0 %v31_v2  ;;  %439 = vmatpush.msrb.mxu1 %v31_v2 }
  0x12   :  { %39 = vperm.xlu0 %722, %v34_v6   ;;  %502 = vmatpush.msrb.mxu2 %v31_v2  ;;  %v48_v6 = vperm.slane %v875_v4, 2 }
  0x13   :  { %565 = vmatpush.msrb.mxu3 %v31_v2  ;;  %377 = vmatpush.msrb.mxu0 %v30_v3 }
  0x14   :  { %440 = vmatpush.msrb.mxu1 %v30_v3  ;;  %503 = vmatpush.msrb.mxu2 %v30_v3 }
  0x15   :  { %566 = vmatpush.msrb.mxu3 %v30_v3  ;;  %378 = vmatpush.msrb.mxu0 %v29_v5 }
  0x16   :  { %441 = vmatpush.msrb.mxu1 %v29_v5  ;;  %504 = vmatpush.msrb.mxu2 %v29_v5 }
  0x17   :  { %567 = vmatpush.msrb.mxu3 %v29_v5  ;;  %379 = vmatpush.msrb.mxu0 %v28_v7 }
  0x18   :  { %442 = vmatpush.msrb.mxu1 %v28_v7  ;;  %505 = vmatpush.msrb.mxu2 %v28_v7 }
  0x19   :  { %568 = vmatpush.msrb.mxu3 %v28_v7 }
  0x84   :  { %v40_v11 = vpop.permute.xlu0 %39 }
  0x85   :  { %v91_v12 = vmul.f32 %v881_v10, %v40_v11 }
  0x87   :  { %v100_v14 = vadd.f32 %v885_v13, %v91_v12 }
  0x8c   :  { %v129_v15 = vpop.f32.mrf.mxu0 }
  0x8d   :  { %v132_v16 = vadd.f32 %v129_v15, %v100_v14 }
  0x8f   :  { %727 = vtanh.f32 %v132_v16  ;;  %v697_v18 = vmul.f32 -1.442695, %v132_v16 }
  0x91   :  { %729 = vpow2.f32 %v697_v18 }
  0x95   :  { %v728_v17 = vpop.eup %727 }
  0x96   :  { %155 = vrot.lane.b32.xlu0 %v728_v17, %s847_s0 }
  0x97   :  { %v730_v19 = vpop.eup %729 }
  0x98   :  { %v136_v20 = vadd.f32 1.0, %v730_v19 }
  0x9a   :  { %731 = vrcp.f32 %v136_v20  ;;  %v148_v26 = vand.u32 2147483648, %v136_v20  ;;  %vm142_vm1 = vweird.f32 %v136_v20  ;;  %v146_v27 = vand.u32 2147483647, %v136_v20 }
  0x9c   :  { %v149_v29 = vor.u32 1.1754944e-38, %v148_v26  ;;  %vm147_vm3 = vcmp.eq.f32.partialorder %v146_v27, 8.507059e+37 }
  0xa0   :  { %v732_v21 = vpop.eup %731 }
  0xa1   :  { %v138_v22 = vmul.f32 %v732_v21, %v136_v20  ;;  %vm143_vm0 = vweird.f32 %v732_v21 }
  0xa2   :  { %vm144_vm2 = vmor %vm142_vm1, %vm143_vm0 }
  0xa3   :  { %v139_v23 = vsub.f32 1.0, %v138_v22 }
  0xa5   :  { %v140_v24 = vmul.f32 %v732_v21, %v139_v23 }
  0xa7   :  { %v141_v25 = vadd.f32 %v732_v21, %v140_v24 }
  0xa9   :  { %v145_v28 = vsel %vm144_vm2, %v732_v21, %v141_v25 }
  0xaa   :  { %v150_v31 = vsel %vm147_vm3, %v149_v29, %v145_v28  ;;  %vm628_vm3 = vcmask 1045504  }
  0xab   :  { %v153_v33 = vmul.f32 0.0, %v150_v31 }
 0x108   :  { %v156_v30 = vpop.permute.xlu0 %155 }
 0x109   :  { %v158_v32 = vmul.f32 %v156_v30, %v150_v31 }
 0x10b   :  { %160 = vrot.lane.b32.xlu1 %v158_v32, %s848_s17  ;;  %v55_v32 = vperm.slane %v875_v4, 3 }
 0x17d   :  { %v161_v34 = vpop.permute.xlu1 %160 }
 0x17e   :  { %v163_v35 = vadd.f32 %v161_v34, %v153_v33 }
 0x180   :  { %733 = vtanh.f32 %v163_v35 }
 0x186   :  { %v734_v36 = vpop.eup %733 }
 0x187   :  { %166 = vrot.lane.b32.xlu1 %v734_v36, %s847_s0 }
 0x1f9   :  { %v167_v37 = vpop.permute.xlu1 %166 }
 0x1fa   :  { %v891_v38 = vmul.f32 %v167_v37, %v150_v31 }
 0x1fc   :  { %171 = vrot.lane.b32.xlu2 %v891_v38, %s848_s17 }
 0x204   :  { %46 = vperm.xlu2 %723, %v41_v39  }
 0x256   :  { %v172_v40 = vpop.permute.xlu2 %171 }
 0x257   :  { %698 = vmatmul.msk.f32.vlgmr.msra.gmra.mxu1 %vm108_vm4, %v172_v40 }
 0x25e   :  { %v47_v41 = vpop.permute.xlu2 %46 }
 0x25f   :  { %v92_v42 = vmul.f32 %v881_v10, %v47_v41 }
 0x261   :  { %v101_v43 = vadd.f32 %v885_v13, %v92_v42 }
 0x2d4   :  { %v192_v44 = vpop.f32.mrf.mxu1 }
 0x2d5   :  { %v195_v45 = vadd.f32 %v192_v44, %v101_v43 }
 0x2d7   :  { %735 = vtanh.f32 %v195_v45  ;;  %v699_v47 = vmul.f32 -1.442695, %v195_v45 }
 0x2d9   :  { %737 = vpow2.f32 %v699_v47 }
 0x2dd   :  { %v736_v46 = vpop.eup %735 }
 0x2de   :  { %218 = vrot.lane.b32.xlu0 %v736_v46, %s847_s0 }
 0x2df   :  { %v738_v48 = vpop.eup %737 }
 0x2e0   :  { %v199_v49 = vadd.f32 1.0, %v738_v48 }
 0x2e2   :  { %739 = vrcp.f32 %v199_v49  ;;  %v211_v55 = vand.u32 2147483648, %v199_v49  ;;  %vm205_vm6 = vweird.f32 %v199_v49  ;;  %v209_v56 = vand.u32 2147483647, %v199_v49 }
 0x2e4   :  { %v212_v58 = vor.u32 1.1754944e-38, %v211_v55  ;;  %vm210_vm8 = vcmp.eq.f32.partialorder %v209_v56, 8.507059e+37 }
 0x2e8   :  { %v740_v50 = vpop.eup %739 }
 0x2e9   :  { %v201_v51 = vmul.f32 %v740_v50, %v199_v49  ;;  %vm206_vm5 = vweird.f32 %v740_v50 }
 0x2ea   :  { %vm207_vm7 = vmor %vm205_vm6, %vm206_vm5 }
 0x2eb   :  { %v202_v52 = vsub.f32 1.0, %v201_v51 }
 0x2ed   :  { %v203_v53 = vmul.f32 %v740_v50, %v202_v52 }
 0x2ef   :  { %v204_v54 = vadd.f32 %v740_v50, %v203_v53 }
 0x2f1   :  { %v208_v57 = vsel %vm207_vm7, %v740_v50, %v204_v54 }
 0x2f2   :  { %v213_v60 = vsel %vm210_vm8, %v212_v58, %v208_v57 }
 0x2f3   :  { %v216_v62 = vmul.f32 %v213_v60, %v163_v35 }
 0x350   :  { %v219_v59 = vpop.permute.xlu0 %218 }
 0x351   :  { %v221_v61 = vmul.f32 %v219_v59, %v213_v60 }
 0x353   :  { %223 = vrot.lane.b32.xlu1 %v221_v61, %s848_s17 }
 0x35b   :  { %53 = vperm.xlu1 %724, %v48_v6  }
 0x3c5   :  { %v224_v63 = vpop.permute.xlu1 %223 }
 0x3c6   :  { %v226_v1 = vadd.f32 %v224_v63, %v216_v62 }
 0x3c8   :  { %741 = vtanh.f32 %v226_v1 }
 0x3cd   :  { %v54_v8 = vpop.permute.xlu1 %53 }
 0x3ce   :  { %v742_v2 = vpop.eup %741  ;;  %v93_v11 = vmul.f32 %v881_v10, %v54_v8 }
 0x3cf   :  { %229 = vrot.lane.b32.xlu2 %v742_v2, %s847_s0  ;;  %v62_v2 = vperm.slane %v875_v4, 4 }
 0x3d0   :  { %v102_v12 = vadd.f32 %v885_v13, %v93_v11 }
 0x429   :  { %v230_v3 = vpop.permute.xlu2 %229 }
 0x42a   :  { %v232_v5 = vmul.f32 %v230_v3, %v213_v60 }
 0x42c   :  { %234 = vrot.lane.b32.xlu0 %v232_v5, %s848_s17  ;;  %v611_v37 = vrot.slane %v232_v5, 6 }
 0x42e   :  { %v625_v42 = vsel %vm624_vm13, %v891_v38, %v611_v37  ;;  %v69_v37 = vperm.slane %v875_v4, 5 }
 0x49e   :  { %v235_v7 = vpop.permute.xlu0 %234 }
 0x49f   :  { %700 = vmatmul.msk.f32.vlgmr.msra.gmra.mxu2 %vm108_vm4, %v235_v7 }
 0x522   :  { %v255_v14 = vpop.f32.mrf.mxu2 }
 0x523   :  { %v258_v15 = vadd.f32 %v255_v14, %v102_v12 }
 0x525   :  { %743 = vtanh.f32 %v258_v15  ;;  %v701_v17 = vmul.f32 -1.442695, %v258_v15 }
 0x527   :  { %745 = vpow2.f32 %v701_v17 }
 0x52b   :  { %v744_v16 = vpop.eup %743 }
 0x52c   :  { %281 = vrot.lane.b32.xlu2 %v744_v16, %s847_s0 }
 0x52d   :  { %v746_v18 = vpop.eup %745 }
 0x52e   :  { %v262_v19 = vadd.f32 1.0, %v746_v18 }
 0x530   :  { %747 = vrcp.f32 %v262_v19  ;;  %v274_v25 = vand.u32 2147483648, %v262_v19  ;;  %vm268_vm10 = vweird.f32 %v262_v19  ;;  %v272_v26 = vand.u32 2147483647, %v262_v19 }
 0x532   :  { %v275_v28 = vor.u32 1.1754944e-38, %v274_v25  ;;  %vm273_vm12 = vcmp.eq.f32.partialorder %v272_v26, 8.507059e+37 }
 0x536   :  { %v748_v20 = vpop.eup %747 }
 0x537   :  { %v264_v21 = vmul.f32 %v748_v20, %v262_v19  ;;  %vm269_vm9 = vweird.f32 %v748_v20 }
 0x538   :  { %vm270_vm11 = vmor %vm268_vm10, %vm269_vm9 }
 0x539   :  { %v265_v22 = vsub.f32 1.0, %v264_v21 }
 0x53b   :  { %v266_v23 = vmul.f32 %v748_v20, %v265_v22 }
 0x53d   :  { %v267_v24 = vadd.f32 %v748_v20, %v266_v23 }
 0x53f   :  { %v271_v27 = vsel %vm270_vm11, %v748_v20, %v267_v24 }
 0x540   :  { %v276_v30 = vsel %vm273_vm12, %v275_v28, %v271_v27 }
 0x541   :  { %v279_v33 = vmul.f32 %v276_v30, %v226_v1 }
 0x586   :  { %v282_v29 = vpop.permute.xlu2 %281 }
 0x587   :  { %v284_v31 = vmul.f32 %v282_v29, %v276_v30 }
 0x589   :  { %286 = vrot.lane.b32.xlu0 %v284_v31, %s848_s17 }
 0x591   :  { %60 = vperm.xlu0 %722, %v55_v32  }
 0x5fb   :  { %v287_v34 = vpop.permute.xlu0 %286 }
 0x5fc   :  { %v289_v35 = vadd.f32 %v287_v34, %v279_v33 }
 0x5fe   :  { %749 = vtanh.f32 %v289_v35 }
 0x603   :  { %v61_v45 = vpop.permute.xlu0 %60 }
 0x604   :  { %v750_v36 = vpop.eup %749  ;;  %v94_v46 = vmul.f32 %v881_v10, %v61_v45 }
 0x605   :  { %292 = vrot.lane.b32.xlu1 %v750_v36, %s847_s0 }
 0x606   :  { %v103_v47 = vadd.f32 %v885_v13, %v94_v46 }
 0x677   :  { %v293_v39 = vpop.permute.xlu1 %292 }
 0x678   :  { %v295_v40 = vmul.f32 %v293_v39, %v276_v30 }
 0x67a   :  { %v613_v41 = vrot.slane %v295_v40, 4  ;;  %297 = vrot.lane.b32.xlu2 %v295_v40, %s848_s17 }
 0x67c   :  { %v627_v43 = vsel %vm626_vm14, %v625_v42, %v613_v41 }
 0x6d4   :  { %v298_v44 = vpop.permute.xlu2 %297 }
 0x6d5   :  { %702 = vmatmul.msk.f32.vlgmr.msra.gmra.mxu3 %vm108_vm4, %v298_v44 }
 0x758   :  { %v318_v48 = vpop.f32.mrf.mxu3 }
 0x759   :  { %v321_v49 = vadd.f32 %v318_v48, %v103_v47 }
 0x75b   :  { %751 = vtanh.f32 %v321_v49  ;;  %v703_v51 = vmul.f32 -1.442695, %v321_v49 }
 0x75d   :  { %753 = vpow2.f32 %v703_v51 }
 0x761   :  { %v752_v50 = vpop.eup %751 }
 0x762   :  { %344 = vrot.lane.b32.xlu1 %v752_v50, %s847_s0 }
 0x763   :  { %v754_v52 = vpop.eup %753 }
 0x764   :  { %v325_v38 = vadd.f32 1.0, %v754_v52 }
 0x766   :  { %755 = vrcp.f32 %v325_v38  ;;  %v337_v58 = vand.u32 2147483648, %v325_v38  ;;  %vm331_vm0 = vweird.f32 %v325_v38  ;;  %v335_v59 = vand.u32 2147483647, %v325_v38 }
 0x768   :  { %v338_v61 = vor.u32 1.1754944e-38, %v337_v58  ;;  %vm336_vm2 = vcmp.eq.f32.partialorder %v335_v59, 8.507059e+37 }
 0x76c   :  { %v756_v53 = vpop.eup %755 }
 0x76d   :  { %v327_v54 = vmul.f32 %v756_v53, %v325_v38  ;;  %vm332_vm15 = vweird.f32 %v756_v53 }
 0x76e   :  { %vm333_vm1 = vmor %vm331_vm0, %vm332_vm15 }
 0x76f   :  { %v328_v55 = vsub.f32 1.0, %v327_v54 }
 0x771   :  { %v329_v56 = vmul.f32 %v756_v53, %v328_v55 }
 0x773   :  { %v330_v57 = vadd.f32 %v756_v53, %v329_v56 }
 0x775   :  { %v334_v60 = vsel %vm333_vm1, %v756_v53, %v330_v57 }
 0x776   :  { %v339_v63 = vsel %vm336_vm2, %v338_v61, %v334_v60 }
 0x777   :  { %v342_v3 = vmul.f32 %v339_v63, %v289_v35 }
 0x7d4   :  { %v345_v62 = vpop.permute.xlu1 %344 }
 0x7d5   :  { %v347_v1 = vmul.f32 %v345_v62, %v339_v63 }
 0x7d7   :  { %349 = vrot.lane.b32.xlu2 %v347_v1, %s848_s17 }
 0x7df   :  { %67 = vperm.xlu2 %723, %v62_v2  }
 0x831   :  { %v350_v5 = vpop.permute.xlu2 %349 }
 0x832   :  { %v352_v6 = vadd.f32 %v350_v5, %v342_v3  ;;  %v76_v3 = vperm.slane %v875_v4, 6 }
 0x834   :  { %757 = vtanh.f32 %v352_v6 }
 0x839   :  { %v68_v16 = vpop.permute.xlu2 %67 }
 0x83a   :  { %v758_v7 = vpop.eup %757  ;;  %v95_v17 = vmul.f32 %v881_v10, %v68_v16 }
 0x83b   :  { %355 = vrot.lane.b32.xlu0 %v758_v7, %s847_s0 }
 0x83c   :  { %v104_v18 = vadd.f32 %v885_v13, %v95_v17 }
 0x8ad   :  { %v356_v8 = vpop.permute.xlu0 %355 }
 0x8ae   :  { %v358_v11 = vmul.f32 %v356_v8, %v339_v63 }
 0x8b0   :  { %v615_v12 = vrot.slane %v358_v11, 2  ;;  %360 = vrot.lane.b32.xlu1 %v358_v11, %s848_s17 }
 0x8b2   :  { %v924_v14 = vsel %vm628_vm3, %v627_v43, %v615_v12 }
 0x922   :  { %v361_v15 = vpop.permute.xlu1 %360 }
 0x923   :  { %704 = vmatmul.msk.f32.vlgmr.msrb.gmra.mxu0 %vm108_vm4, %v361_v15 }
 0x9a0   :  { %v381_v19 = vpop.f32.mrf.mxu0 }
 0x9a1   :  { %v384_v20 = vadd.f32 %v381_v19, %v104_v18 }
 0x9a3   :  { %759 = vtanh.f32 %v384_v20  ;;  %v705_v22 = vmul.f32 -1.442695, %v384_v20 }
 0x9a5   :  { %761 = vpow2.f32 %v705_v22 }
 0x9a9   :  { %v760_v21 = vpop.eup %759 }
 0x9aa   :  { %407 = vrot.lane.b32.xlu0 %v760_v21, %s847_s0 }
 0x9ab   :  { %v762_v23 = vpop.eup %761 }
 0x9ac   :  { %v388_v24 = vadd.f32 1.0, %v762_v23 }
 0x9ae   :  { %763 = vrcp.f32 %v388_v24  ;;  %v400_v30 = vand.u32 2147483648, %v388_v24  ;;  %vm394_vm6 = vweird.f32 %v388_v24  ;;  %v398_v31 = vand.u32 2147483647, %v388_v24 }
 0x9b0   :  { %v401_v33 = vor.u32 1.1754944e-38, %v400_v30  ;;  %vm399_vm8 = vcmp.eq.f32.partialorder %v398_v31, 8.507059e+37 }
 0x9b4   :  { %v764_v25 = vpop.eup %763 }
 0x9b5   :  { %v390_v26 = vmul.f32 %v764_v25, %v388_v24  ;;  %vm395_vm5 = vweird.f32 %v764_v25 }
 0x9b6   :  { %vm396_vm7 = vmor %vm394_vm6, %vm395_vm5 }
 0x9b7   :  { %v391_v27 = vsub.f32 1.0, %v390_v26 }
 0x9b9   :  { %v392_v28 = vmul.f32 %v764_v25, %v391_v27 }
 0x9bb   :  { %v393_v29 = vadd.f32 %v764_v25, %v392_v28 }
 0x9bd   :  { %v397_v32 = vsel %vm396_vm7, %v764_v25, %v393_v29  ;;  %vm678_vm7 = vcmask 122880  }
 0x9be   :  { %v402_v35 = vsel %vm399_vm8, %v401_v33, %v397_v32 }
 0x9bf   :  { %v405_v39 = vmul.f32 %v402_v35, %v352_v6 }
 0xa1c   :  { %v408_v34 = vpop.permute.xlu0 %407 }
 0xa1d   :  { %v410_v36 = vmul.f32 %v408_v34, %v402_v35 }
 0xa1f   :  { %412 = vrot.lane.b32.xlu1 %v410_v36, %s848_s17 }
 0xa27   :  { %74 = vperm.xlu1 %724, %v69_v37   ;;  %v83_v37 = vperm.slane %v875_v4, 7 }
 0xa91   :  { %v413_v40 = vpop.permute.xlu1 %412 }
 0xa92   :  { %v415_v41 = vadd.f32 %v413_v40, %v405_v39 }
 0xa94   :  { %765 = vtanh.f32 %v415_v41 }
 0xa99   :  { %v75_v46 = vpop.permute.xlu1 %74 }
 0xa9a   :  { %v766_v42 = vpop.eup %765  ;;  %v96_v47 = vmul.f32 %v881_v10, %v75_v46 }
 0xa9b   :  { %418 = vrot.lane.b32.xlu2 %v766_v42, %s847_s0 }
 0xa9c   :  { %v105_v48 = vadd.f32 %v885_v13, %v96_v47 }
 0xaf5   :  { %v419_v43 = vpop.permute.xlu2 %418 }
 0xaf6   :  { %v933_v44 = vmul.f32 %v419_v43, %v402_v35 }
 0xaf8   :  { %423 = vrot.lane.b32.xlu0 %v933_v44, %s848_s17 }
 0xb6a   :  { %v424_v45 = vpop.permute.xlu0 %423 }
 0xb6b   :  { %706 = vmatmul.msk.f32.vlgmr.msrb.gmra.mxu1 %vm108_vm4, %v424_v45 }
 0xbe8   :  { %v444_v49 = vpop.f32.mrf.mxu1 }
 0xbe9   :  { %v447_v50 = vadd.f32 %v444_v49, %v105_v48 }
 0xbeb   :  { %767 = vtanh.f32 %v447_v50  ;;  %v707_v52 = vmul.f32 -1.442695, %v447_v50 }
 0xbed   :  { %769 = vpow2.f32 %v707_v52 }
 0xbf1   :  { %v768_v51 = vpop.eup %767 }
 0xbf2   :  { %470 = vrot.lane.b32.xlu2 %v768_v51, %s847_s0 }
 0xbf3   :  { %v770_v38 = vpop.eup %769 }
 0xbf4   :  { %v451_v53 = vadd.f32 1.0, %v770_v38 }
 0xbf6   :  { %771 = vrcp.f32 %v451_v53  ;;  %v463_v59 = vand.u32 2147483648, %v451_v53  ;;  %vm457_vm10 = vweird.f32 %v451_v53  ;;  %v461_v60 = vand.u32 2147483647, %v451_v53 }
 0xbf8   :  { %v464_v62 = vor.u32 1.1754944e-38, %v463_v59  ;;  %vm462_vm12 = vcmp.eq.f32.partialorder %v461_v60, 8.507059e+37 }
 0xbfc   :  { %v772_v54 = vpop.eup %771 }
 0xbfd   :  { %v453_v55 = vmul.f32 %v772_v54, %v451_v53  ;;  %vm458_vm9 = vweird.f32 %v772_v54 }
 0xbfe   :  { %vm459_vm11 = vmor %vm457_vm10, %vm458_vm9 }
 0xbff   :  { %v454_v56 = vsub.f32 1.0, %v453_v55  ;;  %v633_v55 = vperm.slane %v878_v9, 2 }
 0xc01   :  { %v455_v57 = vmul.f32 %v772_v54, %v454_v56 }
 0xc03   :  { %v456_v58 = vadd.f32 %v772_v54, %v455_v57 }
 0xc05   :  { %v460_v61 = vsel %vm459_vm11, %v772_v54, %v456_v58 }
 0xc06   :  { %v465_v1 = vsel %vm462_vm12, %v464_v62, %v460_v61 }
 0xc07   :  { %v468_v5 = vmul.f32 %v465_v1, %v415_v41 }
 0xc4c   :  { %v471_v63 = vpop.permute.xlu2 %470 }
 0xc4d   :  { %v473_v2 = vmul.f32 %v471_v63, %v465_v1 }
 0xc4f   :  { %475 = vrot.lane.b32.xlu0 %v473_v2, %s848_s17 }
 0xc57   :  { %81 = vperm.xlu0 %722, %v76_v3  }
 0xcc1   :  { %v476_v6 = vpop.permute.xlu0 %475 }
 0xcc2   :  { %v478_v7 = vadd.f32 %v476_v6, %v468_v5 }
 0xcc4   :  { %773 = vtanh.f32 %v478_v7 }
 0xcc9   :  { %v82_v16 = vpop.permute.xlu0 %81 }
 0xcca   :  { %v774_v8 = vpop.eup %773  ;;  %v97_v17 = vmul.f32 %v881_v10, %v82_v16 }
 0xccb   :  { %481 = vrot.lane.b32.xlu1 %v774_v8, %s847_s0  ;;  %v850_v8 = vmov 32  }
 0xccc   :  { %v106_v18 = vadd.f32 %v885_v13, %v97_v17  ;;  %725 = vset.pattern.permute.xlu0 %v850_v8 }
 0xd3d   :  { %v482_v11 = vpop.permute.xlu1 %481 }
 0xd3e   :  { %v484_v12 = vmul.f32 %v482_v11, %v465_v1 }
 0xd40   :  { %486 = vrot.lane.b32.xlu2 %v484_v12, %s848_s17  ;;  %v617_v43 = vrot.slane %v484_v12, 6 }
 0xd42   :  { %v630_v48 = vsel %vm624_vm13, %v933_v44, %v617_v43 }
 0xd9a   :  { %v487_v15 = vpop.permute.xlu2 %486 }
 0xd9b   :  { %708 = vmatmul.msk.f32.vlgmr.msrb.gmra.mxu2 %vm108_vm4, %v487_v15 }
 0xe1e   :  { %v507_v19 = vpop.f32.mrf.mxu2 }
 0xe1f   :  { %v510_v20 = vadd.f32 %v507_v19, %v106_v18  ;;  %v851_v19 = vmov 0  }
 0xe21   :  { %775 = vtanh.f32 %v510_v20  ;;  %v709_v22 = vmul.f32 -1.442695, %v510_v20 }
 0xe23   :  { %777 = vpow2.f32 %v709_v22 }
 0xe27   :  { %v776_v21 = vpop.eup %775 }
 0xe28   :  { %533 = vrot.lane.b32.xlu1 %v776_v21, %s847_s0 }
 0xe29   :  { %v778_v23 = vpop.eup %777 }
 0xe2a   :  { %v514_v24 = vadd.f32 1.0, %v778_v23 }
 0xe2c   :  { %779 = vrcp.f32 %v514_v24  ;;  %v526_v30 = vand.u32 2147483648, %v514_v24  ;;  %vm520_vm0 = vweird.f32 %v514_v24  ;;  %v524_v31 = vand.u32 2147483647, %v514_v24 }
 0xe2e   :  { %v527_v33 = vor.u32 1.1754944e-38, %v526_v30  ;;  %vm525_vm2 = vcmp.eq.f32.partialorder %v524_v31, 8.507059e+37 }
 0xe32   :  { %v780_v25 = vpop.eup %779 }
 0xe33   :  { %v516_v26 = vmul.f32 %v780_v25, %v514_v24  ;;  %vm521_vm15 = vweird.f32 %v780_v25 }
 0xe34   :  { %vm522_vm1 = vmor %vm520_vm0, %vm521_vm15 }
 0xe35   :  { %v517_v27 = vsub.f32 1.0, %v516_v26 }
 0xe37   :  { %v518_v28 = vmul.f32 %v780_v25, %v517_v27 }
 0xe39   :  { %v519_v29 = vadd.f32 %v780_v25, %v518_v28 }
 0xe3b   :  { %v523_v32 = vsel %vm522_vm1, %v780_v25, %v519_v29 }
 0xe3c   :  { %v528_v35 = vsel %vm525_vm2, %v527_v33, %v523_v32  ;;  %v671_v32 = vand.u32 127, %v35_v0 }
 0xe3d   :  { %v531_v39 = vmul.f32 %v528_v35, %v478_v7 }
 0xe3e   :  { %v673_v33 = vadd.s32 4294967288, %v671_v32 }
 0xe9a   :  { %v534_v34 = vpop.permute.xlu1 %533 }
 0xe9b   :  { %v536_v36 = vmul.f32 %v534_v34, %v528_v35 }
 0xe9d   :  { %538 = vrot.lane.b32.xlu2 %v536_v36, %s848_s17 }
 0xea5   :  { %88 = vperm.xlu2 %723, %v83_v37  }
 0xef7   :  { %v539_v40 = vpop.permute.xlu2 %538 }
 0xef8   :  { %v541_v41 = vadd.f32 %v539_v40, %v531_v39 }
 0xefa   :  { %781 = vtanh.f32 %v541_v41 }
 0xeff   :  { %v89_v50 = vpop.permute.xlu2 %88 }
 0xf00   :  { %v782_v42 = vpop.eup %781  ;;  %v98_v51 = vmul.f32 %v881_v10, %v89_v50 }
 0xf01   :  { %544 = vrot.lane.b32.xlu0 %v782_v42, %s847_s0 }
 0xf02   :  { %v107_v52 = vadd.f32 %v885_v13, %v98_v51 }
 0xf73   :  { %v545_v45 = vpop.permute.xlu0 %544 }
 0xf74   :  { %v547_v46 = vmul.f32 %v545_v45, %v528_v35 }
 0xf76   :  { %v619_v47 = vrot.slane %v547_v46, 4  ;;  %549 = vrot.lane.b32.xlu1 %v547_v46, %s848_s17 }
 0xf78   :  { %v631_v49 = vsel %vm626_vm14, %v630_v48, %v619_v47 }
 0xfe8   :  { %v550_v4 = vpop.permute.xlu1 %549 }
 0xfe9   :  { %710 = vmatmul.msk.f32.vlgmr.msrb.gmra.mxu3 %vm108_vm4, %v550_v4 }
0x106c   :  { %v570_v38 = vpop.f32.mrf.mxu3 }
0x106d   :  { %v573_v53 = vadd.f32 %v570_v38, %v107_v52 }
0x106f   :  { %783 = vtanh.f32 %v573_v53  ;;  %v711_v44 = vmul.f32 -1.442695, %v573_v53 }
0x1071   :  { %785 = vpow2.f32 %v711_v44 }
0x1075   :  { %v784_v54 = vpop.eup %783 }
0x1076   :  { %596 = vrot.lane.b32.xlu0 %v784_v54, %s847_s0 }
0x1077   :  { %v786_v56 = vpop.eup %785 }
0x1078   :  { %v577_v57 = vadd.f32 1.0, %v786_v56 }
0x107a   :  { %787 = vrcp.f32 %v577_v57  ;;  %v589_v61 = vand.u32 2147483648, %v577_v57  ;;  %vm583_vm14 = vweird.f32 %v577_v57  ;;  %v587_v62 = vand.u32 2147483647, %v577_v57 }
0x107c   :  { %v590_v1 = vor.u32 1.1754944e-38, %v589_v61  ;;  %vm588_vm6 = vcmp.eq.f32.partialorder %v587_v62, 8.507059e+37 }
0x107e   :  { %635 = vrot.lane.b32.xlu0 %v633_v55, %s849_s18 }
0x1080   :  { %v788_v58 = vpop.eup %787 }
0x1081   :  { %v579_v59 = vmul.f32 %v788_v58, %v577_v57  ;;  %vm584_vm13 = vweird.f32 %v788_v58 }
0x1082   :  { %vm585_vm5 = vmor %vm583_vm14, %vm584_vm13 }
0x1083   :  { %v580_v10 = vsub.f32 1.0, %v579_v59 }
0x1085   :  { %v581_v60 = vmul.f32 %v788_v58, %v580_v10 }
0x1086   :  { %656 = vperm.xlu0 %725, %v878_v9  }
0x1087   :  { %v582_v13 = vadd.f32 %v788_v58, %v581_v60 }
0x1089   :  { %v586_v63 = vsel %vm585_vm5, %v788_v58, %v582_v13 }
0x108a   :  { %v591_v3 = vsel %vm588_vm6, %v590_v1, %v586_v63 }
0x108b   :  { %v594_v11 = vmul.f32 %v591_v3, %v541_v41 }
0x108e   :  { %726 = vset.pattern.permute.xlu0 %v851_v19 }
0x10e8   :  { %v597_v2 = vpop.permute.xlu0 %596 }
0x10e9   :  { %v599_v5 = vmul.f32 %v597_v2, %v591_v3 }
0x10eb   :  { %601 = vrot.lane.b32.xlu1 %v599_v5, %s848_s17 }
0x10f0   :  { %v636_v6 = vpop.permute.xlu0 %635 }
0x10f1   :  { %v638_v7 = vmul.f32 %v636_v6, %v924_v14 }
0x10f3   :  { %642 = vrot.lane.b32.xlu1 %v638_v7, %s848_s17 }
0x10f8   :  { %v657_v9 = vpop.permute.xlu0 %656 }
0x10f9   :  { %v658_v24 = vperm.slane %v657_v9, 2 }
0x115d   :  { %v602_v12 = vpop.permute.xlu1 %601 }
0x115e   :  { %v604_v15 = vadd.f32 %v602_v12, %v594_v11 }
0x1160   :  { %789 = vtanh.f32 %v604_v15 }
0x1165   :  { %v643_v16 = vpop.permute.xlu1 %642 }
0x1166   :  { %v790_v17 = vpop.eup %789  ;;  %v648_v18 = vsel %vm108_vm4, %v643_v16, 0.0 }
0x1167   :  { %607 = vrot.lane.b32.xlu2 %v790_v17, %s847_s0  ;;  %649 = vadd.xlane.f32.xlu1 %v648_v18 }
0x11c1   :  { %v608_v14 = vpop.permute.xlu2 %607 }
0x11c2   :  { %v610_v20 = vmul.f32 %v608_v14, %v591_v3 }
0x11c4   :  { %v622_v21 = vrot.slane %v610_v20, 2 }
0x11c6   :  { %v632_v22 = vsel %vm628_vm3, %v631_v49, %v622_v21  ;;  %vm675_vm3 = vcmask 130112  }
0x11c7   :  { %v639_v23 = vmul.f32 %v636_v6, %v632_v22 }
0x11c9   :  { %644 = vrot.lane.b32.xlu2 %v639_v23, %s848_s17 }
0x11da   :  { %v650_v25 = vpop.xlane.xlu1 %649 }
0x11db   :  { %v660_v26 = vadd.f32 %v658_v24, %v650_v25 }
0x11dd   :  { %665 = vperm.xlu0 %726, %v660_v26  }
0x1223   :  { %v645_v27 = vpop.permute.xlu2 %644 }
0x1224   :  { %v651_v28 = vsel %vm108_vm4, %v645_v27, 0.0 }
0x1225   :  { %652 = vadd.xlane.f32.xlu2 %v651_v28 }
0x124f   :  { %v666_v31 = vpop.permute.xlu0 %665 }
0x1250   :  { %v672_v35 = vperm.slane %v666_v31, %v671_v32 }
0x1298   :  { %v653_v29 = vpop.xlane.xlu2 %652 }
0x1299   :  { %v661_v30 = vadd.f32 %v658_v24, %v653_v29 }
0x129b   :  { %668 = vperm.xlu0 %726, %v661_v30  }
0x130d   :  { %v669_v34 = vpop.permute.xlu0 %668 }
0x130e   :  { %v674_v36 = vperm.slane %v669_v34, %v673_v33 }
0x1310   :  { %v676_v37 = vsel %vm675_vm3, %v674_v36, %v672_v35 }
0x1311   :  { %679 = vst.msk [vmem:[#allocation5] sm:$0x1] %vm678_vm7, %v676_v37 }
0x1312   :  { %690 = dma.vmem_to_hbm [thread:$0]  %s686_s20, 16, %s688_s23, [#allocation4]  }
0x1313   :  { %841 = dma.done.wait [#allocation4], 16  }
0x1314   :  { %842 = vsyncadd [#allocation4], 4294967280 }
0x1315   :  { %695 = vsyncpa [#allocation3], 1 }
0x1316   :  { %696 = vsyncpa [#allocation4], 1 }

</bundles_post_ra>
